<compile_context>
chip_gen: v6e
topology: v6e:2x2x1
jax: 0.10.0
libtpu: 0.0.40
codegen_flags: <defaults>
</compile_context>

<pallas_src>
import numpy as np

import jax
import jax.numpy as jnp
from jax import lax
from jax.experimental import pallas as pl
from jax.experimental.pallas import tpu as pltpu


# ----------------------------------------------------------------------------
# Deterministic "parameter" construction (mirrors get_gaussian_kernel1d of the
# PyTorch module; GaussianRKHS uses kernel_reach=6, normalized=True, dx=1).
# Done in numpy so the weights fold into f32 constants at trace time.
# ----------------------------------------------------------------------------
def get_gaussian_kernel1d(sigma, dx=1.0, kernel_size=None, normalized=True,
                          kernel_reach=6):
    if kernel_size is None:
        s = kernel_reach * 2
        kernel_size = max(s, int(sigma * s / dx))
        kernel_size = kernel_size + (1 - kernel_size % 2)  # force odd
    x = np.arange(kernel_size, dtype=np.float64) - (kernel_size // 2)
    if kernel_size % 2 == 0:
        x = x + 0.5
    kernel = np.exp(-(x ** 2) / (2.0 * float(sigma) ** 2))
    if normalized:
        kernel = kernel / kernel.sum()
    return kernel.astype(np.float32)  # (K,)


def _conv_matrix_1d(k1d, length, border_type):
    """(L, L) matrix M with out[o] = sum_i M[o, i] * x[i], i.e. the 1D
    correlation with `k1d` and the given border mode folded in."""
    k = np.asarray(k1d, dtype=np.float64)
    K = k.shape[0]
    pad = (K - 1) // 2
    M = np.zeros((length, length), dtype=np.float64)
    for o in range(length):
        for t in range(K):
            src = o - pad + t
            if border_type == "replicate":
                src = min(max(src, 0), length - 1)
            elif border_type == "circular":
                src = src % length
            elif border_type == "reflect":
                if length > 1:
                    period = 2 * (length - 1)
                    src = src % period
                    if src >= length:
                        src = period - src
                else:
                    src = 0
            elif border_type == "constant":
                if src < 0 or src >= length:
                    continue
            else:
                raise ValueError(f"unsupported border_type {border_type!r}")
            M[o, src] += k[t]
    return M.astype(np.float32)


def _pick_planes_per_block(n_planes, H, W):
    """Number of (H, W) planes handled per grid step.

    Targets ~1 MiB of input rows per block (per-step overhead amortized, DMAs
    big enough for >=85% of HBM roofline), caps the block-diagonal H matrix at
    ~2 MiB, keeps >=2 grid steps so the 'parallel' axis feeds both v7x
    TensorCores, and keeps the sublane dim (P*H) 8-aligned.
    """
    plane_bytes = H * W * 4
    max_p_x = max(1, (1 << 20) // max(plane_bytes, 1))     # x block <= 1 MiB
    max_p_bd = max(1, 724 // max(H, 1))                    # kron(I_P, Mh) <= ~2 MiB
    p_cap = max(1, min(n_planes, max_p_x, max_p_bd))
    if n_planes >= 2:
        p_cap = min(p_cap, (n_planes + 1) // 2)            # >= 2 grid steps

    divisors = [p for p in range(1, n_planes + 1)
                if n_planes % p == 0 and (p * H) % 8 == 0]
    if not divisors:
        # H not 8-aligned and no divisor fixes it: one full block
        # (block dims == array dims is always a legal BlockSpec).
        return n_planes
    under = [p for p in divisors if p <= p_cap]
    return max(under) if under else min(divisors)


# ----------------------------------------------------------------------------
# Pallas kernel: one grid step = P planes, flattened to (P*H, W) rows.
#   bdh_ref : (P*H, P*H) block-diagonal kron(I_P, Mh) height-pass matrix (VMEM)
#   mwT_ref : (W, W)     width-pass matrix (transposed), borders folded in
#   x_ref   : (P*H, W)   input rows
#   o_ref   : (P*H, W)   output rows
# Both passes run on the MXU; accumulation in f32.
# ----------------------------------------------------------------------------
def _blur_kernel(bdh_ref, mwT_ref, x_ref, o_ref):
    x = x_ref[...].astype(jnp.float32)
    # Width pass (lane axis): banded conv-with-border matrix.
    y = jnp.dot(x, mwT_ref[...], preferred_element_type=jnp.float32)
    # Height pass (sublane axis): per-plane conv via block-diagonal matrix.
    z = jnp.dot(bdh_ref[...], y, preferred_element_type=jnp.float32)
    o_ref[...] = z.astype(o_ref.dtype)


def gaussian_rkhs_forward(x, sigma, border_type="replicate", normalized=True,
                          kernel_reach=6, dx=(1.0, 1.0)):
    """Equivalent of GaussianRKHS(sigma, border_type, normalized,
    kernel_reach).forward for a (B, C, H, W) input."""
    B, C, H, W = x.shape
    kh = get_gaussian_kernel1d(float(sigma[0]), float(dx[0]), None,
                               normalized, kernel_reach)
    kw = get_gaussian_kernel1d(float(sigma[1]), float(dx[1]), None,
                               normalized, kernel_reach)

    # Separable 1D conv matrices with the border mode folded in (f32 always).
    Mh = _conv_matrix_1d(kh, H, border_type)            # (H, H)
    MwT = _conv_matrix_1d(kw, W, border_type).T         # (W, W)
    MwT = np.ascontiguousarray(MwT)

    n_planes = B * C
    P = _pick_planes_per_block(n_planes, H, W)
    rows = P * H
    bdh = np.kron(np.eye(P, dtype=np.float32), Mh)      # (P*H, P*H)

    n_blocks = n_planes // P                            # P always divides n_planes
    x2d = x.reshape(n_planes * H, W)                    # free metadata reshape

    out2d = pl.pallas_call(
        _blur_kernel,
        out_shape=jax.ShapeDtypeStruct((n_planes * H, W), x.dtype),
        grid_spec=pltpu.PrefetchScalarGridSpec(
            num_scalar_prefetch=0,
            grid=(n_blocks,),
            in_specs=[
                # conv matrices: constant blocks, resident across the grid
                pl.BlockSpec((rows, rows), lambda i: (0, 0)),
                pl.BlockSpec((W, W), lambda i: (0, 0)),
                # P planes worth of rows per grid step
                pl.BlockSpec((rows, W), lambda i: (i, 0)),
            ],
            out_specs=pl.BlockSpec((rows, W), lambda i: (i, 0)),
        ),
        compiler_params=pltpu.CompilerParams(
            dimension_semantics=("parallel",)),
    )(jnp.asarray(bdh), jnp.asarray(MwT), x2d)

    return out2d.reshape(B, C, H, W)


# ----------------------------------------------------------------------------
# Pure-JAX reference (depthwise conv on a padded input) for checking.
# ----------------------------------------------------------------------------
_PAD_MODE = {"replicate": "edge", "constant": "constant",
             "reflect": "reflect", "circular": "wrap"}


def _reference(x, sigma, border_type="replicate", normalized=True,
               kernel_reach=6, dx=(1.0, 1.0)):
    B, C, H, W = x.shape
    kh = get_gaussian_kernel1d(float(sigma[0]), float(dx[0]), None,
                               normalized, kernel_reach)
    kw = get_gaussian_kernel1d(float(sigma[1]), float(dx[1]), None,
                               normalized, kernel_reach)
    k2d = jnp.asarray(np.outer(kh, kw))
    kH, kW = k2d.shape
    ph, pw = (kH - 1) // 2, (kW - 1) // 2
    xp = jnp.pad(x, ((0, 0), (0, 0), (ph, ph), (pw, pw)),
                 mode=_PAD_MODE[border_type])
    w = jnp.broadcast_to(k2d[None, None, :, :], (C, 1, kH, kW))
    return lax.conv_general_dilated(
        xp, w, window_strides=(1, 1), padding="VALID",
        feature_group_count=C,
        dimension_numbers=("NCHW", "OIHW", "NCHW"),
        precision=lax.Precision.HIGHEST)


if __name__ == "__main__":
    # GaussianRKHS(sigma=(1.0, 1.0), border_type='replicate', normalized=True,
    #              kernel_reach=6)  ->  13x13 separable Gaussian.
    sigma = (1.0, 1.0)

    key = jax.random.PRNGKey(0)
    B, C, H, W = 2, 4, 16, 16
    x = jax.random.normal(key, (B, C, H, W), dtype=jnp.float32)

    out = gaussian_rkhs_forward(x, sigma, border_type="replicate")
    out = jax.block_until_ready(out)

    ref = jax.block_until_ready(_reference(x, sigma, "replicate"))
    assert out.shape == (B, C, H, W)
    err = float(jnp.max(jnp.abs(out - ref)))
    assert err < 1e-4, f"max abs err {err}"

    print("KERNEL_OK")
</pallas_src>

<mosaic_0001>
module attributes {stable_mosaic.version = 11 : i64} {
  func.func @_blur_kernel(%arg0: i32, %arg1: memref<64x64xf32, #tpu.memory_space<vmem>>, %arg2: memref<16x16xf32, #tpu.memory_space<vmem>>, %arg3: memref<64x16xf32, #tpu.memory_space<vmem>>, %arg4: memref<64x16xf32, #tpu.memory_space<vmem>>) attributes {dimension_semantics = [#tpu.dimension_semantics<parallel>], iteration_bounds = array<i64: 2>, scalar_prefetch = 0 : i64, scratch_operands = 0 : i64, tpu.core_type = #tpu.core_type<tc>, window_params = [{pipeline_mode = #tpu.pipeline_mode<synchronous>, transform_indices = @transform_0, window_bounds = array<i64: 64, 64>}, {pipeline_mode = #tpu.pipeline_mode<synchronous>, transform_indices = @transform_1, window_bounds = array<i64: 16, 16>}, {transform_indices = @transform_2, window_bounds = array<i64: 64, 16>}, {transform_indices = @transform_3, window_bounds = array<i64: 64, 16>}]} {
    %c0 = arith.constant 0 : index
    %c0_0 = arith.constant 0 : index
    %0 = vector.load %arg3[%c0, %c0_0] : memref<64x16xf32, #tpu.memory_space<vmem>>, vector<64x16xf32>
    %c0_1 = arith.constant 0 : index
    %c0_2 = arith.constant 0 : index
    %1 = vector.load %arg2[%c0_1, %c0_2] : memref<16x16xf32, #tpu.memory_space<vmem>>, vector<16x16xf32>
    %cst = arith.constant dense<0.000000e+00> : vector<64x16xf32>
    %2 = tpu.matmul %0, %1, %cst {dimension_numbers = #tpu.dot_dimension_numbers<[1], [0], [0], [1], [0, 0, 1, 1], [], []>} : vector<64x16xf32>, vector<16x16xf32>, vector<64x16xf32> -> vector<64x16xf32>
    %c0_3 = arith.constant 0 : index
    %c0_4 = arith.constant 0 : index
    %3 = vector.load %arg1[%c0_3, %c0_4] : memref<64x64xf32, #tpu.memory_space<vmem>>, vector<64x64xf32>
    %cst_5 = arith.constant dense<0.000000e+00> : vector<64x16xf32>
    %4 = tpu.matmul %3, %2, %cst_5 {dimension_numbers = #tpu.dot_dimension_numbers<[1], [0], [0], [1], [0, 0, 1, 1], [], []>} : vector<64x64xf32>, vector<64x16xf32>, vector<64x16xf32> -> vector<64x16xf32>
    %c0_6 = arith.constant 0 : index
    %c0_7 = arith.constant 0 : index
    %5 = vector.load %arg4[%c0_6, %c0_7] : memref<64x16xf32, #tpu.memory_space<vmem>>, vector<64x16xf32>
    tpu.vector_store %arg4[%c0_6, %c0_7], %4 {strides = array<i32>} : memref<64x16xf32, #tpu.memory_space<vmem>>, vector<64x16xf32>,
    return
  }
  func.func @transform_0(%arg0: i32) -> (i32, i32) {
    %c0_i32 = arith.constant 0 : i32
    %c0_i32_0 = arith.constant 0 : i32
    %c0_i32_1 = arith.constant 0 : i32
    return %c0_i32, %c0_i32_0 : i32, i32
  }
  func.func @transform_1(%arg0: i32) -> (i32, i32) {
    %c0_i32 = arith.constant 0 : i32
    %c0_i32_0 = arith.constant 0 : i32
    %c0_i32_1 = arith.constant 0 : i32
    return %c0_i32, %c0_i32_0 : i32, i32
  }
  func.func @transform_2(%arg0: i32) -> (i32, i32) {
    %c0_i32 = arith.constant 0 : i32
    %c0_i32_0 = arith.constant 0 : i32
    return %arg0, %c0_i32 : i32, i32
  }
  func.func @transform_3(%arg0: i32) -> (i32, i32) {
    %c0_i32 = arith.constant 0 : i32
    %c0_i32_0 = arith.constant 0 : i32
    return %arg0, %c0_i32 : i32, i32
  }
}

</mosaic_0001>

<bundles_post_ra>
// kernel: tpu_custom_call.1
= control target key start
LH: loop header
LB: loop body
LE: loop exit
PB: predicated region body
PF: predicated region fallthrough
CT: control target
= control target key end

     0   :  { %s665_s12 = smov 0   ;;  %s743_s0 = inlined_call_operand.vmem [shape: f32[64,64], index: 0, kind: input, shape index: {}]   ;;  %s744_s1 = inlined_call_operand.vmem [shape: f32[16,16], index: 1, kind: input, shape index: {}]   ;;  %s745_s2 = inlined_call_operand.vmem [shape: f32[128,16], index: 2, kind: input, shape index: {}]   ;;  %s746_s3 = inlined_call_operand.vmem [shape: f32[128,16], index: 3, kind: output, shape index: {}]  }
   0x1 LB: > { %s516_s13 = sadd.s32 4294967295, %s643_s12   ;;  %p520_p0 = scmp.ge.s32.totalorder %s643_s12, 1  ;;  %s643_s12 = sphi %s665_s12, %s13_s12  }
   0x2   : > { %p138_p1 = scmp.lt.s32.totalorder %s643_s12, 3 }
   0x4   : > { %p139_p2 = pnand %p520_p0, %p138_p1 }
   0x5   : > { %s521_s18 = sshll.u32 (!%p139_p2), %s516_s13, 3 }
   0x6   : > { %142 = sbr.rel (%p139_p2) target bundleno = 441 (0x1b9), region = 32  ;;  %p163_p3 = scmp.lt.s32.totalorder (!%p139_p2), %s521_s18, 15 }
   0xb   : > { %v183_v0 = vld [vmem:[%s744_s1 + $0x8] sm:$0xff]  ;;  %v182_v1 = vld [vmem:[%s744_s1] sm:$0xff]  ;;  %s748_s18 = smov (!%p163_p3, %s521_s18), 15  ;;  %vm184_vm0 = vcmask 130048   ;;  %v316_v10 = vld [vmem:[%s743_s0 + $0x10] sm:$0xff]  ;;  %vm322_vm1 = vcmask 523264  }
   0xc   : > { %569 = vmatprep.subr.mxu0 %v183_v0  ;;  %s522_s19 = sshll.u32 %s748_s18, 3  ;;  %604 = vmatprep.mubr.msk.f32.mxu1 %vm322_vm1, %v316_v10  ;;  %v314_v11 = vld [vmem:[%s743_s0] sm:$0xff]  ;;  %v317_v20 = vld [vmem:[%s743_s0 + $0x18] sm:$0xff]  ;;  %v315_v21 = vld [vmem:[%s743_s0 + $0x8] sm:$0xff] }
   0xd   : > { %570 = vmatpush3.msra.mxu0 %v183_v0  ;;  %s166_s22 = scalar_lea.vmem %s745_s2, %s522_s19  ;;  %v318_v22 = vld [vmem:[%s743_s0 + $0x20] sm:$0xff]  ;;  %v319_v23 = vld [vmem:[%s743_s0 + $0x28] sm:$0xff]  ;;  %v320_v24 = vld [vmem:[%s743_s0 + $0x30] sm:$0xff]  ;;  %s172_s15 = scalar_lea.vmem %s746_s3, %s522_s19 }
   0xe   : > { %571 = vmatprep.subr.mxu0 %v182_v1  ;;  %v174_v2 = vld [vmem:[%s166_s22] sm:$0xff]  ;;  %v175_v3 = vld [vmem:[%s166_s22 + $0x8] sm:$0xff]  ;;  %v176_v4 = vld [vmem:[%s166_s22 + $0x10] sm:$0xff] }
   0xf   : > { %572 = vmatpush3.msra.mxu0 %v182_v1  ;;  %573 = vmatprep.mubr.msk.f32.mxu0 %vm184_vm0, %v174_v2  ;;  %v177_v5 = vld [vmem:[%s166_s22 + $0x18] sm:$0xff]  ;;  %v178_v6 = vld [vmem:[%s166_s22 + $0x20] sm:$0xff]  ;;  %v179_v7 = vld [vmem:[%s166_s22 + $0x28] sm:$0xff] }
  0x10   : > { %574 = vmatmul.mubr.msk.f32.vlgmr.msra.gmra.mxu0 %vm184_vm0, %v175_v3  ;;  %v180_v8 = vld [vmem:[%s166_s22 + $0x30] sm:$0xff]  ;;  %v181_v9 = vld [vmem:[%s166_s22 + $0x38] sm:$0xff] }
  0x11   : > { %576 = vmatprep.mubr.msk.f32.mxu0 %vm184_vm0, %v176_v4  ;;  %v321_v25 = vld [vmem:[%s743_s0 + $0x38] sm:$0xff] }
  0x14   : > { %577 = vmatmul.mubr.msk.f32.gmra.mxu0 %vm184_vm0, %v177_v5 }
  0x15   : > { %579 = vmatprep.mubr.msk.f32.mxu0 %vm184_vm0, %v178_v6 }
  0x18   : > { %580 = vmatmul.mubr.msk.f32.gmra.mxu0 %vm184_vm0, %v179_v7 }
  0x19   : > { %582 = vmatprep.mubr.msk.f32.mxu0 %vm184_vm0, %v180_v8 }
  0x1c   : > { %583 = vmatmul.mubr.msk.f32.gmra.mxu0 %vm184_vm0, %v181_v9 }
  0x1d   : > { %601 = vmatprep.mubr.msk.f32.mxu0 %vm322_vm1, %v314_v11 }
  0xd0   : > { %v575_v12 = vpop.f32.mrf.mxu0 }
  0xd2   : > { %v275_v13 = vpop.f32.mrf.mxu0 }
  0xd4   : > { %v578_v14 = vpop.f32.mrf.mxu0 }
  0xd6   : > { %v285_v15 = vpop.f32.mrf.mxu0 }
  0xd8   : > { %v581_v16 = vpop.f32.mrf.mxu0 }
  0xda   : > { %v295_v17 = vpop.f32.mrf.mxu0 }
  0xdc   : > { %v584_v18 = vpop.f32.mrf.mxu0 }
  0xdd   : > { %585 = vmatprep.subr.mxu0 %v584_v18  ;;  %613 = vmatprep.subr.mxu1 %v584_v18 }
  0xde   : > { %v305_v19 = vpop.f32.mrf.mxu0  ;;  %586 = vmatpush3.msra.mxu0 %v584_v18  ;;  %621 = vmatpush3.msra.mxu1 %v584_v18 }
  0xdf   : > { %587 = vmatprep.subr.mxu0 %v305_v19  ;;  %614 = vmatprep.subr.mxu1 %v305_v19 }
  0xe0   : > { %588 = vmatpush3.msra.mxu0 %v305_v19  ;;  %622 = vmatpush3.msra.mxu1 %v305_v19 }
  0xe1   : > { %589 = vmatprep.subr.mxu0 %v581_v16  ;;  %615 = vmatprep.subr.mxu1 %v581_v16 }
  0xe2   : > { %590 = vmatpush3.msra.mxu0 %v581_v16  ;;  %623 = vmatpush3.msra.mxu1 %v581_v16 }
  0xe3   : > { %591 = vmatprep.subr.mxu0 %v295_v17  ;;  %616 = vmatprep.subr.mxu1 %v295_v17 }
  0xe4   : > { %592 = vmatpush3.msra.mxu0 %v295_v17  ;;  %624 = vmatpush3.msra.mxu1 %v295_v17 }
  0xe5   : > { %593 = vmatprep.subr.mxu0 %v578_v14  ;;  %617 = vmatprep.subr.mxu1 %v578_v14 }
  0xe6   : > { %594 = vmatpush3.msra.mxu0 %v578_v14  ;;  %625 = vmatpush3.msra.mxu1 %v578_v14 }
  0xe7   : > { %595 = vmatprep.subr.mxu0 %v285_v15  ;;  %618 = vmatprep.subr.mxu1 %v285_v15 }
  0xe8   : > { %596 = vmatpush3.msra.mxu0 %v285_v15  ;;  %626 = vmatpush3.msra.mxu1 %v285_v15 }
  0xe9   : > { %597 = vmatprep.subr.mxu0 %v575_v12  ;;  %619 = vmatprep.subr.mxu1 %v575_v12 }
  0xea   : > { %598 = vmatpush3.msra.mxu0 %v575_v12  ;;  %627 = vmatpush3.msra.mxu1 %v575_v12 }
  0xeb   : > { %599 = vmatprep.subr.mxu0 %v275_v13  ;;  %620 = vmatprep.subr.mxu1 %v275_v13 }
  0xec   : > { %600 = vmatpush3.msra.mxu0 %v275_v13  ;;  %628 = vmatpush3.msra.mxu1 %v275_v13 }
  0xed   : > { %605 = vmatmul.mubr.msk.f32.vlgmr.msra.gmra.mxu1 %vm322_vm1, %v317_v20  ;;  %602 = vmatmul.mubr.msk.f32.vlgmr.msra.gmra.mxu0 %vm322_vm1, %v315_v21 }
  0xee   : > { %607 = vmatprep.mubr.msk.f32.mxu1 %vm322_vm1, %v318_v22 }
  0xf1   : > { %608 = vmatmul.mubr.msk.f32.gmra.mxu1 %vm322_vm1, %v319_v23 }
  0xf2   : > { %610 = vmatprep.mubr.msk.f32.mxu1 %vm322_vm1, %v320_v24 }
  0xf5   : > { %611 = vmatmul.mubr.msk.f32.gmra.mxu1 %vm322_vm1, %v321_v25 }
 0x1ad   : > { %v606_v26 = vpop.f32.mrf.mxu1  ;;  %v603_v27 = vpop.f32.mrf.mxu0 }
 0x1ae   : > { %455 = vst.msk [vmem:[%s172_s15 + $0x18] sm:$0xff] %vm184_vm0, %v606_v26  ;;  %453 = vst.msk [vmem:[%s172_s15 + $0x8] sm:$0xff] %vm184_vm0, %v603_v27 }
 0x1af   : > { %v423_v28 = vpop.f32.mrf.mxu1  ;;  %v413_v29 = vpop.f32.mrf.mxu0 }
 0x1b0   : > { %454 = vst.msk [vmem:[%s172_s15 + $0x10] sm:$0xff] %vm184_vm0, %v423_v28  ;;  %452 = vst.msk [vmem:[%s172_s15] sm:$0xff] %vm184_vm0, %v413_v29 }
 0x1b1   : > { %v609_v30 = vpop.f32.mrf.mxu1 }
 0x1b2   : > { %457 = vst.msk [vmem:[%s172_s15 + $0x28] sm:$0xff] %vm184_vm0, %v609_v30 }
 0x1b3   : > { %v433_v31 = vpop.f32.mrf.mxu1 }
 0x1b4   : > { %456 = vst.msk [vmem:[%s172_s15 + $0x20] sm:$0xff] %vm184_vm0, %v433_v31 }
 0x1b5   : > { %v612_v32 = vpop.f32.mrf.mxu1 }
 0x1b6   : > { %459 = vst.msk [vmem:[%s172_s15 + $0x38] sm:$0xff] %vm184_vm0, %v612_v32 }
 0x1b7   : > { %v443_v33 = vpop.f32.mrf.mxu1 }
 0x1b8   : > { %458 = vst.msk [vmem:[%s172_s15 + $0x30] sm:$0xff] %vm184_vm0, %v443_v33 }
 0x1b9 PF: > { %s13_s12 = sadd.s32 1, %s643_s12  }
 0x1ba   : > { %p10_p4 = scmp.ge.s32.totalorder %s13_s12, 4  }
 0x1bc   :  { %12 = sbr.rel (!%p10_p4) target bundleno = 1 (0x1), region = 62 }

</bundles_post_ra>
